<compile_context>
chip_gen: v5e
topology: v5e:2x2
jax: 0.10.0
libtpu: 0.0.40
codegen_flags: <defaults>
</compile_context>

<pallas_src>
import functools

import jax
import jax.numpy as jnp
from jax.experimental import pallas as pl
from jax.experimental.pallas import tpu as pltpu


# ---------------------------------------------------------------------------
# Kernel
# ---------------------------------------------------------------------------
def _encoder_ffn_sublayer_kernel(x_ref, g_ref, bb_ref, w1_ref, b1_ref, w2_ref,
                                 b2_ref, o_ref, xn_ref, acc_ref, *, eps, dm1):
    # Grid: (i over row tiles [parallel], f over d_ff tiles [arbitrary/reduction])
    # x_ref : (tm, d_model)            g_ref/bb_ref/b2_ref : (1, d_model) f32
    # w1_ref: (d_model, tf)            b1_ref: (1, tf) f32
    # w2_ref: (tf, d_model)            o_ref : (tm, d_model)
    # xn_ref: (tm, d_model) compute-dtype scratch (LayerNorm output)
    # acc_ref: (tm, d_model) f32 scratch accumulator
    f = pl.program_id(1)

    @pl.when(f == 0)
    def _init():
        # LayerNorm with torch semantics: unbiased std, a*(x-mean)/(std+eps)+b
        x = x_ref[...].astype(jnp.float32)
        mean = jnp.mean(x, axis=-1, keepdims=True)
        xc = x - mean
        var = jnp.sum(xc * xc, axis=-1, keepdims=True) * (1.0 / dm1)
        std = jnp.sqrt(var)
        xn = g_ref[...] * xc / (std + eps) + bb_ref[...]
        xn_ref[...] = xn.astype(xn_ref.dtype)
        # Fold b2 into the accumulator initialization (added exactly once).
        acc_ref[...] = jnp.broadcast_to(b2_ref[...], acc_ref.shape)

    # Partial FFN over this d_ff tile; f32 accumulation on the MXU.
    h = jnp.dot(xn_ref[...], w1_ref[...], preferred_element_type=jnp.float32)
    h = jnp.maximum(h + b1_ref[...], 0.0)                       # bias + ReLU
    acc_ref[...] += jnp.dot(h.astype(w2_ref.dtype), w2_ref[...],
                            preferred_element_type=jnp.float32)

    @pl.when(f == pl.num_programs(1) - 1)
    def _store():
        # Residual add; downcast only at the final store.
        o_ref[...] = (x_ref[...].astype(jnp.float32) + acc_ref[...]).astype(o_ref.dtype)


# ---------------------------------------------------------------------------
# Wrapper
# ---------------------------------------------------------------------------
def _round_up(x, m):
    return ((x + m - 1) // m) * m


def _pick_dff_tile(d_ff, want, align=128):
    """Largest multiple of `align` that divides d_ff and is <= want, else d_ff."""
    if d_ff <= want:
        return d_ff
    t = (want // align) * align
    while t >= align:
        if d_ff % t == 0:
            return t
        t -= align
    return d_ff


def encoder_ffn_sublayer(x, gamma, beta, w1, b1, w2, b2, *,
                         tm=256, tf=512, eps=1e-6, compute_dtype=None):
    """Fused residual FFN sublayer of EncoderLayer.

    x: [batch, seq, d_model] -> [batch, seq, d_model]
    W1: [d_model, d_ff], W2: [d_ff, d_model] (pre-transposed vs torch Linear).
    compute_dtype: optional dtype for the matmul inputs (e.g. jnp.bfloat16 on
    v6e/v7x); accumulation is always f32.
    """
    batch, seq, d_model = x.shape
    d_ff = w1.shape[1]
    M = batch * seq

    cdt = jnp.dtype(compute_dtype) if compute_dtype is not None else jnp.dtype(x.dtype)
    row_align = 8 if cdt.itemsize >= 4 else 32 // cdt.itemsize   # 8 f32 / 16 bf16

    # Row tile: as large as requested, clamped to the (aligned) token count.
    tm_eff = min(_round_up(tm, row_align), _round_up(M, row_align))
    m_pad = _round_up(M, tm_eff)
    # d_ff tile: multiple of 128 (lane-dense) that divides d_ff, or full d_ff.
    tf_eff = _pick_dff_tile(d_ff, tf, 128)

    num_m = m_pad // tm_eff
    num_f = d_ff // tf_eff

    x2d = x.reshape(M, d_model)
    if m_pad != M:
        x2d = jnp.pad(x2d, ((0, m_pad - M), (0, 0)))

    g2d = gamma.reshape(1, d_model).astype(jnp.float32)
    bt2d = beta.reshape(1, d_model).astype(jnp.float32)
    b1_2d = b1.reshape(1, d_ff).astype(jnp.float32)
    b2_2d = b2.reshape(1, d_model).astype(jnp.float32)
    w1c = w1.astype(cdt)
    w2c = w2.astype(cdt)

    out_itemsize = jnp.dtype(x.dtype).itemsize
    x_itemsize = x2d.dtype.itemsize

    # --- VMEM budget (double-buffered pipeline inputs + scratch) -----------
    est = 0
    est += 2 * tm_eff * d_model * x_itemsize            # x tile
    est += 2 * tm_eff * d_model * out_itemsize          # out tile
    est += 2 * d_model * tf_eff * cdt.itemsize          # W1 tile
    est += 2 * tf_eff * d_model * cdt.itemsize          # W2 tile
    est += 2 * (tf_eff + 3 * d_model) * 4               # biases / LN params
    est += tm_eff * d_model * 4                         # acc scratch (f32)
    est += tm_eff * d_model * cdt.itemsize              # xn scratch
    vmem_limit = int(min(max(2 * est, 32 * 1024 * 1024), 64 * 1024 * 1024))

    # --- Cost estimate for the XLA scheduler --------------------------------
    flops = 4 * m_pad * d_model * d_ff                  # two matmuls, 2 flops/MAC
    bytes_accessed = (m_pad * d_model * (x_itemsize + out_itemsize)
                      + d_model * d_ff * 2 * cdt.itemsize
                      + (d_ff + 3 * d_model) * 4)
    cost = pl.CostEstimate(flops=flops, transcendentals=m_pad,
                           bytes_accessed=bytes_accessed)

    grid_spec = pltpu.PrefetchScalarGridSpec(
        num_scalar_prefetch=0,
        grid=(num_m, num_f),
        in_specs=[
            pl.BlockSpec((tm_eff, d_model), lambda i, f: (i, 0)),   # x (resident across f)
            pl.BlockSpec((1, d_model), lambda i, f: (0, 0)),        # gamma
            pl.BlockSpec((1, d_model), lambda i, f: (0, 0)),        # beta
            pl.BlockSpec((d_model, tf_eff), lambda i, f: (0, f)),   # W1 tile (streamed)
            pl.BlockSpec((1, tf_eff), lambda i, f: (0, f)),         # b1 tile
            pl.BlockSpec((tf_eff, d_model), lambda i, f: (f, 0)),   # W2 tile (streamed)
            pl.BlockSpec((1, d_model), lambda i, f: (0, 0)),        # b2
        ],
        out_specs=pl.BlockSpec((tm_eff, d_model), lambda i, f: (i, 0)),
        scratch_shapes=[
            pltpu.VMEM((tm_eff, d_model), cdt),           # LayerNorm(x) scratch
            pltpu.VMEM((tm_eff, d_model), jnp.float32),   # f32 accumulator
        ],
    )

    out2d = pl.pallas_call(
        functools.partial(_encoder_ffn_sublayer_kernel,
                          eps=eps, dm1=float(d_model - 1)),
        out_shape=jax.ShapeDtypeStruct((m_pad, d_model), x.dtype),
        grid_spec=grid_spec,
        compiler_params=pltpu.CompilerParams(
            dimension_semantics=("parallel", "arbitrary"),
            vmem_limit_bytes=vmem_limit),
        cost_estimate=cost,
    )(x2d, g2d, bt2d, w1c, b1_2d, w2c, b2_2d)

    return out2d[:M].reshape(batch, seq, d_model)


# ---------------------------------------------------------------------------
# Reference (pure JAX) and parameter init
# ---------------------------------------------------------------------------
def reference_encoder_ffn_sublayer(x, gamma, beta, w1, b1, w2, b2, eps=1e-6):
    mean = x.mean(-1, keepdims=True)
    xc = x - mean
    var = jnp.sum(xc * xc, axis=-1, keepdims=True) / (x.shape[-1] - 1)  # unbiased
    std = jnp.sqrt(var)
    xn = gamma * xc / (std + eps) + beta
    h = jnp.maximum(xn @ w1 + b1, 0.0)
    return x + (h @ w2 + b2)      # dropout == identity (eval)


def init_params(key, d_model, d_ff, dtype=jnp.float32):
    """torch.nn.Linear-style init (uniform +/- 1/sqrt(fan_in)); non-trivial LN params."""
    k1, k2, k3, k4, k5, k6 = jax.random.split(key, 6)
    bound1 = 1.0 / (d_model ** 0.5)
    bound2 = 1.0 / (d_ff ** 0.5)
    gamma = 1.0 + 0.05 * jax.random.normal(k5, (d_model,), dtype)
    beta = 0.05 * jax.random.normal(k6, (d_model,), dtype)
    w1 = jax.random.uniform(k1, (d_model, d_ff), dtype, -bound1, bound1)
    b1 = jax.random.uniform(k2, (d_ff,), dtype, -bound1, bound1)
    w2 = jax.random.uniform(k3, (d_ff, d_model), dtype, -bound2, bound2)
    b2 = jax.random.uniform(k4, (d_model,), dtype, -bound2, bound2)
    return gamma, beta, w1, b1, w2, b2


if __name__ == "__main__":
    key = jax.random.PRNGKey(0)
    # Small but lane-dense shapes (d_model, d_ff multiples of 128 per review).
    batch, seq, d_model, d_ff = 2, 16, 128, 256

    kx, kp = jax.random.split(key)
    x = jax.random.normal(kx, (batch, seq, d_model), jnp.float32)
    params = init_params(kp, d_model, d_ff)

    ref = reference_encoder_ffn_sublayer(x, *params)

    # f32 path
    out = jax.block_until_ready(encoder_ffn_sublayer(x, *params))
    assert out.shape == (batch, seq, d_model)
    assert jnp.allclose(out, ref, atol=1e-4, rtol=1e-4)

    # bf16 matmul-input path (v6e/v7x recommendation); f32 accumulation.
    out_bf16 = jax.block_until_ready(
        encoder_ffn_sublayer(x, *params, compute_dtype=jnp.bfloat16))
    assert jnp.allclose(out_bf16, ref, atol=1e-1, rtol=1e-1)

    print("KERNEL_OK")
</pallas_src>

<mosaic_0001>
module attributes {stable_mosaic.version = 11 : i64} {
  func.func @_encoder_ffn_sublayer_kernel(%arg0: i32, %arg1: i32, %arg2: memref<32x128xf32, #tpu.memory_space<vmem>>, %arg3: memref<1x128xf32, #tpu.memory_space<vmem>>, %arg4: memref<1x128xf32, #tpu.memory_space<vmem>>, %arg5: memref<128x256xf32, #tpu.memory_space<vmem>>, %arg6: memref<1x256xf32, #tpu.memory_space<vmem>>, %arg7: memref<256x128xf32, #tpu.memory_space<vmem>>, %arg8: memref<1x128xf32, #tpu.memory_space<vmem>>, %arg9: memref<32x128xf32, #tpu.memory_space<vmem>>, %arg10: memref<32x128xf32, #tpu.memory_space<vmem>>, %arg11: memref<32x128xf32, #tpu.memory_space<vmem>>) attributes {dimension_semantics = [#tpu.dimension_semantics<parallel>, #tpu.dimension_semantics<arbitrary>], iteration_bounds = array<i64: 1, 1>, scalar_prefetch = 0 : i64, scratch_operands = 2 : i64, tpu.core_type = #tpu.core_type<tc>, window_params = [{transform_indices = @transform_0, window_bounds = array<i64: 32, 128>}, {pipeline_mode = #tpu.pipeline_mode<synchronous>, transform_indices = @transform_1, window_bounds = array<i64: 1, 128>}, {pipeline_mode = #tpu.pipeline_mode<synchronous>, transform_indices = @transform_2, window_bounds = array<i64: 1, 128>}, {transform_indices = @transform_3, window_bounds = array<i64: 128, 256>}, {transform_indices = @transform_4, window_bounds = array<i64: 1, 256>}, {transform_indices = @transform_5, window_bounds = array<i64: 256, 128>}, {pipeline_mode = #tpu.pipeline_mode<synchronous>, transform_indices = @transform_6, window_bounds = array<i64: 1, 128>}, {transform_indices = @transform_7, window_bounds = array<i64: 32, 128>}]} {
    %c0_i32 = arith.constant 0 : i32
    %0 = arith.cmpi eq, %arg1, %c0_i32 : i32
    %1 = arith.extui %0 : i1 to i32
    %c0_i32_0 = arith.constant 0 : i32
    %2 = arith.cmpi ne, %1, %c0_i32_0 : i32
    scf.if %2 {
      %c0_16 = arith.constant 0 : index
      %c0_17 = arith.constant 0 : index
      %19 = vector.load %arg2[%c0_16, %c0_17] : memref<32x128xf32, #tpu.memory_space<vmem>>, vector<32x128xf32>
      %cst_18 = arith.constant dense<0.000000e+00> : vector<32xf32>
      %20 = vector.multi_reduction <add>, %19, %cst_18 [1] : vector<32x128xf32> to vector<32xf32>
      %21 = vector.shape_cast %20 : vector<32xf32> to vector<32x1xf32>
      %cst_19 = arith.constant 1.280000e+02 : f32
      %22 = vector.broadcast %cst_19 : f32 to vector<32x1xf32>
      %23 = arith.divf %21, %22 : vector<32x1xf32>
      %24 = vector.broadcast %23 : vector<32x1xf32> to vector<32x128xf32>
      %25 = arith.subf %19, %24 : vector<32x128xf32>
      %26 = arith.mulf %25, %25 : vector<32x128xf32>
      %cst_20 = arith.constant dense<0.000000e+00> : vector<32xf32>
      %27 = vector.multi_reduction <add>, %26, %cst_20 [1] : vector<32x128xf32> to vector<32xf32>
      %28 = vector.shape_cast %27 : vector<32xf32> to vector<32x1xf32>
      %cst_21 = arith.constant 0.00787401571 : f32
      %29 = vector.broadcast %cst_21 : f32 to vector<32x1xf32>
      %30 = arith.mulf %28, %29 : vector<32x1xf32>
      %31 = math.sqrt %30 : vector<32x1xf32>
      %c0_22 = arith.constant 0 : index
      %c0_23 = arith.constant 0 : index
      %32 = vector.load %arg3[%c0_22, %c0_23] : memref<1x128xf32, #tpu.memory_space<vmem>>, vector<1x128xf32>
      %33 = vector.broadcast %32 : vector<1x128xf32> to vector<32x128xf32>
      %34 = arith.mulf %33, %25 : vector<32x128xf32>
      %cst_24 = arith.constant 9.99999997E-7 : f32
      %35 = vector.broadcast %cst_24 : f32 to vector<32x1xf32>
      %36 = arith.addf %31, %35 : vector<32x1xf32>
      %37 = vector.broadcast %36 : vector<32x1xf32> to vector<32x128xf32>
      %38 = arith.divf %34, %37 : vector<32x128xf32>
      %c0_25 = arith.constant 0 : index
      %c0_26 = arith.constant 0 : index
      %39 = vector.load %arg4[%c0_25, %c0_26] : memref<1x128xf32, #tpu.memory_space<vmem>>, vector<1x128xf32>
      %40 = vector.broadcast %39 : vector<1x128xf32> to vector<32x128xf32>
      %41 = arith.addf %38, %40 : vector<32x128xf32>
      %c0_27 = arith.constant 0 : index
      %c0_28 = arith.constant 0 : index
      %42 = vector.load %arg10[%c0_27, %c0_28] : memref<32x128xf32, #tpu.memory_space<vmem>>, vector<32x128xf32>
      tpu.vector_store %arg10[%c0_27, %c0_28], %41 {strides = array<i32>} : memref<32x128xf32, #tpu.memory_space<vmem>>, vector<32x128xf32>,
      %c0_29 = arith.constant 0 : index
      %c0_30 = arith.constant 0 : index
      %43 = vector.load %arg8[%c0_29, %c0_30] : memref<1x128xf32, #tpu.memory_space<vmem>>, vector<1x128xf32>
      %44 = vector.shape_cast %43 : vector<1x128xf32> to vector<1x128xf32>
      %45 = vector.broadcast %44 : vector<1x128xf32> to vector<32x128xf32>
      %c0_31 = arith.constant 0 : index
      %c0_32 = arith.constant 0 : index
      %46 = vector.load %arg11[%c0_31, %c0_32] : memref<32x128xf32, #tpu.memory_space<vmem>>, vector<32x128xf32>
      tpu.vector_store %arg11[%c0_31, %c0_32], %45 {strides = array<i32>} : memref<32x128xf32, #tpu.memory_space<vmem>>, vector<32x128xf32>,
    } else {
    }
    %c0 = arith.constant 0 : index
    %c0_1 = arith.constant 0 : index
    %3 = vector.load %arg10[%c0, %c0_1] : memref<32x128xf32, #tpu.memory_space<vmem>>, vector<32x128xf32>
    %c0_2 = arith.constant 0 : index
    %c0_3 = arith.constant 0 : index
    %4 = vector.load %arg5[%c0_2, %c0_3] : memref<128x256xf32, #tpu.memory_space<vmem>>, vector<128x256xf32>
    %cst = arith.constant dense<0.000000e+00> : vector<32x256xf32>
    %5 = tpu.matmul %3, %4, %cst {dimension_numbers = #tpu.dot_dimension_numbers<[1], [0], [0], [1], [0, 0, 1, 1], [], []>} : vector<32x128xf32>, vector<128x256xf32>, vector<32x256xf32> -> vector<32x256xf32>
    %c0_4 = arith.constant 0 : index
    %c0_5 = arith.constant 0 : index
    %6 = vector.load %arg6[%c0_4, %c0_5] : memref<1x256xf32, #tpu.memory_space<vmem>>, vector<1x256xf32>
    %7 = vector.broadcast %6 : vector<1x256xf32> to vector<32x256xf32>
    %8 = arith.addf %5, %7 : vector<32x256xf32>
    %cst_6 = arith.constant 0.000000e+00 : f32
    %9 = vector.broadcast %cst_6 : f32 to vector<32x256xf32>
    %10 = arith.maximumf %8, %9 : vector<32x256xf32>
    %c0_7 = arith.constant 0 : index
    %c0_8 = arith.constant 0 : index
    %11 = vector.load %arg11[%c0_7, %c0_8] : memref<32x128xf32, #tpu.memory_space<vmem>>, vector<32x128xf32>
    %c0_9 = arith.constant 0 : index
    %c0_10 = arith.constant 0 : index
    %12 = vector.load %arg7[%c0_9, %c0_10] : memref<256x128xf32, #tpu.memory_space<vmem>>, vector<256x128xf32>
    %cst_11 = arith.constant dense<0.000000e+00> : vector<32x128xf32>
    %13 = tpu.matmul %10, %12, %cst_11 {dimension_numbers = #tpu.dot_dimension_numbers<[1], [0], [0], [1], [0, 0, 1, 1], [], []>} : vector<32x256xf32>, vector<256x128xf32>, vector<32x128xf32> -> vector<32x128xf32>
    %14 = arith.addf %11, %13 : vector<32x128xf32>
    %c0_12 = arith.constant 0 : index
    %c0_13 = arith.constant 0 : index
    %15 = vector.load %arg11[%c0_12, %c0_13] : memref<32x128xf32, #tpu.memory_space<vmem>>, vector<32x128xf32>
    tpu.vector_store %arg11[%c0_12, %c0_13], %14 {strides = array<i32>} : memref<32x128xf32, #tpu.memory_space<vmem>>, vector<32x128xf32>,
    %c0_i32_14 = arith.constant 0 : i32
    %16 = arith.cmpi eq, %arg1, %c0_i32_14 : i32
    %17 = arith.extui %16 : i1 to i32
    %c0_i32_15 = arith.constant 0 : i32
    %18 = arith.cmpi ne, %17, %c0_i32_15 : i32
    scf.if %18 {
      %c0_16 = arith.constant 0 : index
      %c0_17 = arith.constant 0 : index
      %19 = vector.load %arg2[%c0_16, %c0_17] : memref<32x128xf32, #tpu.memory_space<vmem>>, vector<32x128xf32>
      %c0_18 = arith.constant 0 : index
      %c0_19 = arith.constant 0 : index
      %20 = vector.load %arg11[%c0_18, %c0_19] : memref<32x128xf32, #tpu.memory_space<vmem>>, vector<32x128xf32>
      %21 = arith.addf %19, %20 : vector<32x128xf32>
      %c0_20 = arith.constant 0 : index
      %c0_21 = arith.constant 0 : index
      %22 = vector.load %arg9[%c0_20, %c0_21] : memref<32x128xf32, #tpu.memory_space<vmem>>, vector<32x128xf32>
      tpu.vector_store %arg9[%c0_20, %c0_21], %21 {strides = array<i32>} : memref<32x128xf32, #tpu.memory_space<vmem>>, vector<32x128xf32>,
    } else {
    }
    return
  }
  func.func @transform_0(%arg0: i32, %arg1: i32) -> (i32, i32) {
    %c0_i32 = arith.constant 0 : i32
    %c0_i32_0 = arith.constant 0 : i32
    return %arg0, %c0_i32 : i32, i32
  }
  func.func @transform_1(%arg0: i32, %arg1: i32) -> (i32, i32) {
    %c0_i32 = arith.constant 0 : i32
    %c0_i32_0 = arith.constant 0 : i32
    %c0_i32_1 = arith.constant 0 : i32
    return %c0_i32, %c0_i32_0 : i32, i32
  }
  func.func @transform_2(%arg0: i32, %arg1: i32) -> (i32, i32) {
    %c0_i32 = arith.constant 0 : i32
    %c0_i32_0 = arith.constant 0 : i32
    %c0_i32_1 = arith.constant 0 : i32
    return %c0_i32, %c0_i32_0 : i32, i32
  }
  func.func @transform_3(%arg0: i32, %arg1: i32) -> (i32, i32) {
    %c0_i32 = arith.constant 0 : i32
    %c0_i32_0 = arith.constant 0 : i32
    return %c0_i32, %arg1 : i32, i32
  }
  func.func @transform_4(%arg0: i32, %arg1: i32) -> (i32, i32) {
    %c0_i32 = arith.constant 0 : i32
    %c0_i32_0 = arith.constant 0 : i32
    return %c0_i32, %arg1 : i32, i32
  }
  func.func @transform_5(%arg0: i32, %arg1: i32) -> (i32, i32) {
    %c0_i32 = arith.constant 0 : i32
    %c0_i32_0 = arith.constant 0 : i32
    return %arg1, %c0_i32 : i32, i32
  }
  func.func @transform_6(%arg0: i32, %arg1: i32) -> (i32, i32) {
    %c0_i32 = arith.constant 0 : i32
    %c0_i32_0 = arith.constant 0 : i32
    %c0_i32_1 = arith.constant 0 : i32
    return %c0_i32, %c0_i32_0 : i32, i32
  }
  func.func @transform_7(%arg0: i32, %arg1: i32) -> (i32, i32) {
    %c0_i32 = arith.constant 0 : i32
    %c0_i32_0 = arith.constant 0 : i32
    return %arg0, %c0_i32 : i32, i32
  }
}

</mosaic_0001>

<bundles_post_ra>
// kernel: tpu_custom_call.1
= control target key start
LH: loop header
LB: loop body
LE: loop exit
PB: predicated region body
PF: predicated region fallthrough
CT: control target
= control target key end

     0   :  { %12 = vsyncpa [#allocation5], 0  ;;  %s904_s0 = inlined_call_operand.hbm [shape: f32[32,128], index: 0, kind: input, shape index: {}]   ;;  %s905_s1 = inlined_call_operand.hbm [shape: f32[1,128], index: 1, kind: input, shape index: {}]   ;;  %s906_s2 = inlined_call_operand.vmem [shape: f32[1,128], index: 2, kind: input, shape index: {}]   ;;  %s907_s3 = inlined_call_operand.hbm [shape: f32[128,256], index: 3, kind: input, shape index: {}]   ;;  %s908_s4 = inlined_call_operand.vmem [shape: f32[1,256], index: 4, kind: input, shape index: {}]   ;;  %s909_s5 = inlined_call_operand.hbm [shape: f32[256,128], index: 5, kind: input, shape index: {}]   ;;  %s910_s6 = inlined_call_operand.vmem [shape: f32[1,128], index: 6, kind: input, shape index: {}]   ;;  %s911_s7 = inlined_call_operand.hbm [shape: f32[32,128], index: 7, kind: output, shape index: {}]  }
   0x1   :  { %13 = vsyncpa [#allocation8], 0 }
   0x2   :  { %14 = vsyncpa [#allocation11], 0  ;;  %s34_s26 = sshll.u32 %s905_s1, 4  ;;  %s35_s26 = int_to_ptr.hbm [resolvable:$true] %s34_s26 }
   0x3   :  { %15 = vsyncpa [#allocation6], 0  ;;  %s684_s27 = smov [#allocation7]   ;;  %s20_s8 = sshll.u32 %s904_s0, 4  ;;  %s21_s8 = int_to_ptr.hbm [resolvable:$true] %s20_s8 }
   0x4   :  { %s36_s28 = sshll.u32 %s684_s27, 4  ;;  %s685_s9 = smov [#allocation4]   ;;  %s37_s28 = int_to_ptr.vmem [resolvable:$true] %s36_s28 }
   0x5   :  { %39 = dma.hbm_to_vmem [thread:$0]  %s35_s26, 16, %s37_s28, [#allocation8]  }
   0x6   :  { %s22_s10 = sshll.u32 %s685_s9, 4  ;;  %s686_s11 = smov 128   ;;  %s23_s10 = int_to_ptr.vmem [resolvable:$true] %s22_s10 }
   0x7   :  { %s687_s12 = smov 8   ;;  %s46_s14 = sshll.u32 %s907_s3, 4  ;;  %s47_s14 = int_to_ptr.hbm [resolvable:$true] %s46_s14 }
   0x8   :  { %28 = dma.hbm_to_vmem [thread:$0]  %s21_s8, 512, %s23_s10, [#allocation5], %s686_s11, %s686_s11, %s687_s12  }
   0x9   :  { %s688_s15 = smov [#allocation9]   ;;  %s61_s18 = sshll.u32 %s909_s5, 4  ;;  %s62_s18 = int_to_ptr.hbm [resolvable:$true] %s61_s18 }
   0xa   :  { %s48_s16 = sshll.u32 %s688_s15, 4  ;;  %s689_s19 = smov 256   ;;  %s49_s16 = int_to_ptr.vmem [resolvable:$true] %s48_s16 }
   0xb   :  { %s690_s20 = smov 16   ;;  %s691_s21 = smov [#allocation10]  }
   0xc   :  { %54 = dma.hbm_to_vmem [thread:$0]  %s47_s14, 4096, %s49_s16, [#allocation8], %s689_s19, %s689_s19, %s690_s20  }
   0xd   :  { %s63_s22 = sshll.u32 %s691_s21, 4  ;;  %s64_s22 = int_to_ptr.vmem [resolvable:$true] %s63_s22 }
   0xe   :  { %69 = dma.hbm_to_vmem [thread:$0]  %s62_s18, 4096, %s64_s22, [#allocation11], %s686_s11, %s686_s11, %s687_s12  }
   0xf   :  { %676 = dma.done.wait [#allocation5], 512  }
  0x10   :  { %677 = vsyncadd [#allocation5], 4294966784 }
  0x11   :  { %678 = dma.done.wait [#allocation8], 4112  }
  0x12   :  { %679 = vsyncadd [#allocation8], 4294963184 }
  0x13   :  { %680 = dma.done.wait [#allocation11], 4096  }
  0x14   :  { %681 = vsyncadd [#allocation11], 4294963200  ;;  %v752_v0 = vld [vmem:[#allocation4 + $0x10] sm:$0xff]  ;;  %v754_v1 = vld [vmem:[#allocation4] sm:$0xff]  ;;  %v692_v4 = vmov 128.0   ;;  %s510_s28 = sshll.u32 %s911_s7, 4  ;;  %s511_s28 = int_to_ptr.hbm [resolvable:$true] %s510_s28 }
  0x15   :  { %100 = vadd.xlane.f32.xlu1 %v752_v0  ;;  %96 = vadd.xlane.f32.xlu0 %v754_v1  ;;  %v758_v2 = vld [vmem:[#allocation4 + $0x18] sm:$0xff]  ;;  %v760_v3 = vld [vmem:[#allocation4 + $0x8] sm:$0xff]  ;;  %538 = vrcp.f32 %v692_v4 }
  0x16   :  { %v309_v27 = vld [vmem:[#allocation9 + $0xf0] sm:$0xff]  ;;  %v310_v28 = vld [vmem:[#allocation9 + $0xf8] sm:$0xff]  ;;  %v307_v29 = vld [vmem:[#allocation9 + $0xe0] sm:$0xff] }
  0x17   :  { %317 = vmatpush.msra.mxu0 %v309_v27  ;;  %346 = vmatpush.msra.mxu1 %v310_v28  ;;  %v308_v30 = vld [vmem:[#allocation9 + $0xe8] sm:$0xff]  ;;  %v305_v31 = vld [vmem:[#allocation9 + $0xd0] sm:$0xff]  ;;  %v306_v32 = vld [vmem:[#allocation9 + $0xd8] sm:$0xff] }
  0x18   :  { %v303_v33 = vld [vmem:[#allocation9 + $0xc0] sm:$0xff]  ;;  %v304_v34 = vld [vmem:[#allocation9 + $0xc8] sm:$0xff]  ;;  %v301_v35 = vld [vmem:[#allocation9 + $0xb0] sm:$0xff] }
  0x19   :  { %318 = vmatpush.msra.mxu0 %v307_v29  ;;  %347 = vmatpush.msra.mxu1 %v308_v30  ;;  %v302_v36 = vld [vmem:[#allocation9 + $0xb8] sm:$0xff]  ;;  %v299_v37 = vld [vmem:[#allocation9 + $0xa0] sm:$0xff]  ;;  %v300_v38 = vld [vmem:[#allocation9 + $0xa8] sm:$0xff] }
  0x1a   :  { %v297_v39 = vld [vmem:[#allocation9 + $0x90] sm:$0xff]  ;;  %v298_v40 = vld [vmem:[#allocation9 + $0x98] sm:$0xff]  ;;  %v295_v41 = vld [vmem:[#allocation9 + $0x80] sm:$0xff] }
  0x1b   :  { %v539_v5 = vpop.eup %538  ;;  %319 = vmatpush.msra.mxu0 %v305_v31  ;;  %348 = vmatpush.msra.mxu1 %v306_v32  ;;  %v296_v42 = vld [vmem:[#allocation9 + $0x88] sm:$0xff]  ;;  %v293_v43 = vld [vmem:[#allocation9 + $0x70] sm:$0xff]  ;;  %v294_v44 = vld [vmem:[#allocation9 + $0x78] sm:$0xff] }
  0x1c   :  { %v105_v6 = vmul.f32 128.0, %v539_v5  ;;  %vm109_vm0 = vweird.f32 %v539_v5  ;;  %v291_v47 = vld [vmem:[#allocation9 + $0x60] sm:$0xff]  ;;  %v292_v48 = vld [vmem:[#allocation9 + $0x68] sm:$0xff]  ;;  %v289_v51 = vld [vmem:[#allocation9 + $0x50] sm:$0xff] }
  0x1d   :  { %102 = vadd.xlane.f32.xlu1 %v758_v2  ;;  %98 = vadd.xlane.f32.xlu0 %v760_v3  ;;  %v290_v52 = vld [vmem:[#allocation9 + $0x58] sm:$0xff]  ;;  %v287_v53 = vld [vmem:[#allocation9 + $0x40] sm:$0xff]  ;;  %v288_v54 = vld [vmem:[#allocation9 + $0x48] sm:$0xff] }
  0x1e   :  { %v106_v7 = vsub.f32 1.0, %v105_v6  ;;  %320 = vmatpush.msra.mxu0 %v303_v33  ;;  %349 = vmatpush.msra.mxu1 %v304_v34  ;;  %v285_v55 = vld [vmem:[#allocation9 + $0x30] sm:$0xff]  ;;  %v286_v56 = vld [vmem:[#allocation9 + $0x38] sm:$0xff]  ;;  %v283_v59 = vld [vmem:[#allocation9 + $0x20] sm:$0xff] }
  0x1f   :  { %v284_v60 = vld [vmem:[#allocation9 + $0x28] sm:$0xff]  ;;  %v281_v6 = vld [vmem:[#allocation9 + $0x10] sm:$0xff] }
  0x20   :  { %v107_v8 = vmul.f32 %v539_v5, %v106_v7  ;;  %321 = vmatpush.msra.mxu0 %v301_v35  ;;  %350 = vmatpush.msra.mxu1 %v302_v36  ;;  %v282_v7 = vld [vmem:[#allocation9 + $0x18] sm:$0xff] }
  0x22   :  { %v108_v9 = vadd.f32 %v539_v5, %v107_v8  ;;  %322 = vmatpush.msra.mxu0 %v299_v37  ;;  %351 = vmatpush.msra.mxu1 %v300_v38 }
  0x24   :  { %v110_v10 = vsel %vm109_vm0, %v539_v5, %v108_v9  ;;  %323 = vmatpush.msra.mxu0 %v297_v39  ;;  %352 = vmatpush.msra.mxu1 %v298_v40 }
  0x26   :  { %324 = vmatpush.msra.mxu0 %v295_v41  ;;  %353 = vmatpush.msra.mxu1 %v296_v42 }
  0x28   :  { %325 = vmatpush.msra.mxu0 %v293_v43  ;;  %354 = vmatpush.msra.mxu1 %v294_v44 }
  0x2a   :  { %326 = vmatpush.msra.mxu0 %v291_v47  ;;  %355 = vmatpush.msra.mxu1 %v292_v48 }
  0x2c   :  { %327 = vmatpush.msra.mxu0 %v289_v51  ;;  %356 = vmatpush.msra.mxu1 %v290_v52 }
  0x2e   :  { %328 = vmatpush.msra.mxu0 %v287_v53  ;;  %357 = vmatpush.msra.mxu1 %v288_v54 }
  0x30   :  { %329 = vmatpush.msra.mxu0 %v285_v55  ;;  %358 = vmatpush.msra.mxu1 %v286_v56 }
  0x32   :  { %330 = vmatpush.msra.mxu0 %v283_v59  ;;  %359 = vmatpush.msra.mxu1 %v284_v60 }
  0x34   :  { %331 = vmatpush.msra.mxu0 %v281_v6  ;;  %360 = vmatpush.msra.mxu1 %v282_v7 }
  0x88   :  { %v101_v11 = vpop.xlane.xlu1 %100  ;;  %v97_v12 = vpop.xlane.xlu0 %96 }
  0x89   :  { %v113_v13 = vmul.f32 %v110_v10, %v101_v11  ;;  %v111_v14 = vmul.f32 %v110_v10, %v97_v12  ;;  %v280_v11 = vld [vmem:[#allocation9 + $0x8] sm:$0xff] }
  0x8a   :  { %361 = vmatpush.msra.mxu1 %v280_v11  ;;  %v401_v11 = vld [vmem:[#allocation10 + $0x70] sm:$0xff] }
  0x8b   :  { %v765_v15 = vsub.f32 %v752_v0, %v113_v13  ;;  %v768_v16 = vsub.f32 %v754_v1, %v111_v14 }
  0x8d   :  { %v121_v17 = vmul.f32 %v765_v15, %v765_v15  ;;  %v119_v18 = vmul.f32 %v768_v16, %v768_v16 }
  0x8f   :  { %127 = vadd.xlane.f32.xlu0 %v121_v17  ;;  %123 = vadd.xlane.f32.xlu2 %v119_v18 }
  0x90   :  { %v103_v19 = vpop.xlane.xlu1 %102  ;;  %v99_v20 = vpop.xlane.xlu0 %98 }
  0x91   :  { %v114_v21 = vmul.f32 %v110_v10, %v103_v19  ;;  %v112_v22 = vmul.f32 %v110_v10, %v99_v20  ;;  %v279_v10 = vld [vmem:[#allocation9] sm:$0xff] }
  0x92   :  { %332 = vmatpush.msra.mxu0 %v279_v10  ;;  %v418_v10 = vld [vmem:[#allocation10 + $0xf8] sm:$0xff] }
  0x93   :  { %v775_v23 = vsub.f32 %v758_v2, %v114_v21  ;;  %v778_v24 = vsub.f32 %v760_v3, %v112_v22  ;;  %448 = vmatpush.msra.mxu3 %v418_v10  ;;  %v408_v10 = vld [vmem:[#allocation10 + $0xa8] sm:$0xff] }
  0x95   :  { %v122_v25 = vmul.f32 %v775_v23, %v775_v23  ;;  %v120_v26 = vmul.f32 %v778_v24, %v778_v24 }
  0x97   :  { %129 = vadd.xlane.f32.xlu1 %v122_v25  ;;  %125 = vadd.xlane.f32.xlu2 %v120_v26 }
 0x102   :  { %v124_v45 = vpop.xlane.xlu2 %123  ;;  %v128_v46 = vpop.xlane.xlu0 %127 }
 0x103   :  { %v784_v49 = vmul.f32 0.007874016, %v124_v45  ;;  %v786_v50 = vmul.f32 0.007874016, %v128_v46 }
 0x105   :  { %540 = vrsqrt.f32 %v784_v49  ;;  %vm166_vm1 = vcmp.eq.f32.partialorder %v786_v50, inf  ;;  %vm142_vm2 = vcmp.eq.f32.partialorder %v784_v49, inf  ;;  %v145_v31 = vand.u32 2147483648, %v784_v49 }
 0x106   :  { %542 = vrsqrt.f32 %v786_v50  ;;  %v169_v32 = vand.u32 2147483648, %v786_v50  ;;  %vm144_vm3 = vcmp.eq.f32.partialorder %v784_v49, 0.0  ;;  %vm168_vm4 = vcmp.eq.f32.partialorder %v786_v50, 0.0 }
 0x10a   :  { %v130_v57 = vpop.xlane.xlu1 %129  ;;  %v126_v58 = vpop.xlane.xlu2 %125 }
 0x10b   :  { %v541_v61 = vpop.eup %540  ;;  %v790_v62 = vmul.f32 0.007874016, %v130_v57  ;;  %v792_v63 = vmul.f32 0.007874016, %v126_v58 }
 0x10c   :  { %v543_v4 = vpop.eup %542  ;;  %v136_v5 = vmul.f32 %v541_v61, %v784_v49 }
 0x10d   :  { %v160_v8 = vmul.f32 %v543_v4, %v786_v50  ;;  %544 = vrsqrt.f32 %v790_v62  ;;  %vm178_vm5 = vcmp.eq.f32.partialorder %v790_v62, inf  ;;  %v181_v46 = vand.u32 2147483648, %v790_v62 }
 0x10e   :  { %v137_v9 = vmul.f32 %v541_v61, %v136_v5  ;;  %546 = vrsqrt.f32 %v792_v63  ;;  %vm154_vm6 = vcmp.eq.f32.partialorder %v792_v63, inf  ;;  %v157_v48 = vand.u32 2147483648, %v792_v63 }
 0x10f   :  { %v161_v12 = vmul.f32 %v543_v4, %v160_v8  ;;  %vm180_vm7 = vcmp.eq.f32.partialorder %v790_v62, 0.0  ;;  %vm156_vm8 = vcmp.eq.f32.partialorder %v792_v63, 0.0 }
 0x110   :  { %v138_v13 = vmul.f32 0.5, %v137_v9  ;;  %v402_v9 = vld [vmem:[#allocation10 + $0x78] sm:$0xff] }
 0x111   :  { %v162_v14 = vmul.f32 0.5, %v161_v12  ;;  %419 = vmatpush.msra.mxu2 %v402_v9  ;;  %v392_v9 = vld [vmem:[#allocation10 + $0x28] sm:$0xff] }
 0x112   :  { %v139_v17 = vsub.f32 1.5, %v138_v13 }
 0x113   :  { %v545_v18 = vpop.eup %544  ;;  %v163_v19 = vsub.f32 1.5, %v162_v14  ;;  %420 = vmatpush.msra.mxu2 %v401_v11 }
 0x114   :  { %v547_v20 = vpop.eup %546  ;;  %v140_v21 = vmul.f32 %v541_v61, %v139_v17  ;;  %v172_v22 = vmul.f32 %v545_v18, %v790_v62  ;;  %v833_v61 = vld [vmem:[#allocation7] ss:$0 sm:$0xff] }
 0x115   :  { %v164_v25 = vmul.f32 %v543_v4, %v163_v19  ;;  %v148_v26 = vmul.f32 %v547_v20, %v792_v63  ;;  %v187_v13 = vmul.f32 %v833_v61, %v768_v16  ;;  %v848_v17 = vld [vmem:[%s906_s2] ss:$0 sm:$0xff] }
 0x116   :  { %v141_v27 = vmul.f32 %v140_v21, %v784_v49  ;;  %v173_v28 = vmul.f32 %v545_v18, %v172_v22  ;;  %v400_v21 = vld [vmem:[#allocation10 + $0x68] sm:$0xff] }
 0x117   :  { %v165_v29 = vmul.f32 %v164_v25, %v786_v50  ;;  %v149_v30 = vmul.f32 %v547_v20, %v148_v26  ;;  %v416_v22 = vld [vmem:[#allocation10 + $0xe8] sm:$0xff]  ;;  %421 = vmatpush.msra.mxu2 %v400_v21 }
 0x118   :  { %v174_v33 = vmul.f32 0.5, %v173_v28  ;;  %v143_v34 = vsel %vm142_vm2, %v784_v49, %v141_v27 }
 0x119   :  { %v150_v35 = vmul.f32 0.5, %v149_v30  ;;  %v146_v36 = vsel %vm144_vm3, %v145_v31, %v143_v34  ;;  %v167_v37 = vsel %vm166_vm1, %v786_v50, %v165_v29  ;;  %v399_v30 = vld [vmem:[#allocation10 + $0x60] sm:$0xff]  ;;  %v398_v34 = vld [vmem:[#allocation10 + $0x58] sm:$0xff] }
 0x11a   :  { %v175_v38 = vsub.f32 1.5, %v174_v33  ;;  %v191_v39 = vadd.f32 1e-06, %v146_v36  ;;  %v170_v40 = vsel %vm168_vm4, %v169_v32, %v167_v37  ;;  %v415_v31 = vld [vmem:[#allocation10 + $0xe0] sm:$0xff]  ;;  %422 = vmatpush.msra.mxu2 %v399_v30 }
 0x11b   :  { %v151_v41 = vsub.f32 1.5, %v150_v35  ;;  %v810_v42 = vadd.f32 1e-06, %v170_v40  ;;  %v414_v35 = vld [vmem:[#allocation10 + $0xd8] sm:$0xff] }
 0x11c   :  { %v176_v43 = vmul.f32 %v545_v18, %v175_v38  ;;  %548 = vrcp.f32 %v191_v39  ;;  %v206_v59 = vand.u32 2147483648, %v191_v39  ;;  %vm200_vm10 = vweird.f32 %v191_v39  ;;  %v417_v18 = vld [vmem:[#allocation10 + $0xf0] sm:$0xff]  ;;  %423 = vmatpush.msra.mxu2 %v398_v34 }
 0x11d   :  { %v152_v44 = vmul.f32 %v547_v20, %v151_v41  ;;  %550 = vrcp.f32 %v810_v42  ;;  %449 = vmatpush.msra.mxu3 %v417_v18  ;;  %v236_v41 = vand.u32 2147483648, %v810_v42  ;;  %vm230_vm2 = vweird.f32 %v810_v42 }
 0x11e   :  { %v177_v45 = vmul.f32 %v176_v43, %v790_v62  ;;  %v207_v7 = vor.u32 1.1754944e-38, %v206_v59  ;;  %v397_v43 = vld [vmem:[#allocation10 + $0x50] sm:$0xff]  ;;  %v189_v59 = vmul.f32 %v833_v61, %v765_v15 }
 0x11f   :  { %v153_v47 = vmul.f32 %v152_v44, %v792_v63  ;;  %450 = vmatpush.msra.mxu3 %v416_v22  ;;  %v413_v44 = vld [vmem:[#allocation10 + $0xd0] sm:$0xff]  ;;  %424 = vmatpush.msra.mxu2 %v397_v43 }
 0x120   :  { %v179_v49 = vsel %vm178_vm5, %v790_v62, %v177_v45  ;;  %v389_v22 = vld [vmem:[#allocation10 + $0x10] sm:$0xff] }
 0x121   :  { %v155_v50 = vsel %vm154_vm6, %v792_v63, %v153_v47  ;;  %v182_v51 = vsel %vm180_vm7, %v181_v46, %v179_v49  ;;  %v204_v63 = vand.u32 2147483647, %v191_v39  ;;  %451 = vmatpush.msra.mxu3 %v415_v31  ;;  %v234_v46 = vand.u32 2147483647, %v810_v42  ;;  %v412_v49 = vld [vmem:[#allocation10 + $0xc8] sm:$0xff] }
 0x122   :  { %v549_v52 = vpop.eup %548  ;;  %v158_v53 = vsel %vm156_vm8, %v157_v48, %v155_v50  ;;  %v823_v54 = vadd.f32 1e-06, %v182_v51 }
 0x123   :  { %v825_v55 = vpop.eup %550  ;;  %v196_v56 = vmul.f32 %v549_v52, %v191_v39  ;;  %v827_v57 = vadd.f32 1e-06, %v158_v53  ;;  %vm201_vm9 = vweird.f32 %v549_v52  ;;  %vm205_vm12 = vcmp.eq.f32.partialorder %v204_v63, 8.507059e+37  ;;  %452 = vmatpush.msra.mxu3 %v414_v35 }
 0x124   :  { %552 = vrcp.f32 %v823_v54  ;;  %v226_v60 = vmul.f32 %v825_v55, %v810_v42  ;;  %vm835_vm11 = vmor %vm200_vm10, %vm201_vm9  ;;  %vm231_vm14 = vweird.f32 %v825_v55  ;;  %v188_v39 = vmul.f32 %v833_v61, %v778_v24  ;;  %v396_v24 = vld [vmem:[#allocation10 + $0x48] sm:$0xff] }
 0x125   :  { %v197_v58 = vsub.f32 1.0, %v196_v56  ;;  %554 = vrcp.f32 %v827_v57  ;;  %v221_v29 = vand.u32 2147483648, %v827_v57  ;;  %v219_v33 = vand.u32 2147483647, %v827_v57  ;;  %vm867_vm3 = vmor %vm230_vm2, %vm231_vm14  ;;  %453 = vmatpush.msra.mxu3 %v413_v44  ;;  %425 = vmatpush.msra.mxu2 %v396_v24  ;;  %v395_v56 = vld [vmem:[#allocation10 + $0x40] sm:$0xff] }
 0x126   :  { %v227_v8 = vsub.f32 1.0, %v226_v60  ;;  %vm215_vm15 = vweird.f32 %v827_v57  ;;  %v237_v42 = vor.u32 1.1754944e-38, %v236_v41  ;;  %vm235_vm4 = vcmp.eq.f32.partialorder %v234_v46, 8.507059e+37  ;;  %v394_v60 = vld [vmem:[#allocation10 + $0x38] sm:$0xff] }
 0x127   :  { %v198_v62 = vmul.f32 %v549_v52, %v197_v58  ;;  %v222_v40 = vor.u32 1.1754944e-38, %v221_v29  ;;  %vm220_vm1 = vcmp.eq.f32.partialorder %v219_v33, 8.507059e+37  ;;  %454 = vmatpush.msra.mxu3 %v412_v49  ;;  %v251_v63 = vand.u32 2147483648, %v823_v54  ;;  %426 = vmatpush.msra.mxu2 %v395_v56 }
 0x128   :  { %v228_v26 = vmul.f32 %v825_v55, %v227_v8  ;;  %vm245_vm6 = vweird.f32 %v823_v54  ;;  %v249_v5 = vand.u32 2147483647, %v823_v54  ;;  %v409_v8 = vld [vmem:[#allocation10 + $0xb0] sm:$0xff] }
 0x129   :  { %v199_v4 = vadd.f32 %v549_v52, %v198_v62  ;;  %v410_v62 = vld [vmem:[#allocation10 + $0xb8] sm:$0xff]  ;;  %427 = vmatpush.msra.mxu2 %v394_v60  ;;  %v252_v11 = vor.u32 1.1754944e-38, %v251_v63 }
 0x12a   :  { %v839_v6 = vpop.eup %552  ;;  %v229_v37 = vadd.f32 %v825_v55, %v228_v26  ;;  %vm250_vm8 = vcmp.eq.f32.partialorder %v249_v5, 8.507059e+37  ;;  %v404_v26 = vld [vmem:[#allocation10 + $0x88] sm:$0xff] }
 0x12b   :  { %v555_v12 = vpop.eup %554  ;;  %v203_v14 = vsel %vm835_vm11, %v549_v52, %v199_v4  ;;  %v241_v27 = vmul.f32 %v839_v6, %v823_v54  ;;  %vm246_vm5 = vweird.f32 %v839_v6  ;;  %v190_v54 = vmul.f32 %v833_v61, %v775_v23  ;;  %v387_v23 = vld [vmem:[#allocation10] sm:$0xff] }
 0x12c   :  { %v208_v19 = vsel %vm205_vm12, %v207_v7, %v203_v14  ;;  %v211_v20 = vmul.f32 %v555_v12, %v827_v57  ;;  %vm216_vm13 = vweird.f32 %v555_v12  ;;  %v233_v51 = vsel %vm867_vm3, %v825_v55, %v229_v37  ;;  %v411_v57 = vld [vmem:[#allocation10 + $0xc0] sm:$0xff]  ;;  %v393_v7 = vld [vmem:[#allocation10 + $0x30] sm:$0xff]  ;;  %vm247_vm7 = vmor %vm245_vm6, %vm246_vm5 }
 0x12d   :  { %v209_v25 = vmul.f32 %v208_v19, %v187_v13  ;;  %v242_v38 = vsub.f32 1.0, %v241_v27  ;;  %vm217_vm0 = vmor %vm215_vm15, %vm216_vm13  ;;  %v238_v58 = vsel %vm235_vm4, %v237_v42, %v233_v51  ;;  %455 = vmatpush.msra.mxu3 %v411_v57  ;;  %428 = vmatpush.msra.mxu2 %v393_v7  ;;  %v391_v13 = vld [vmem:[#allocation10 + $0x20] sm:$0xff]  ;;  %v390_v19 = vld [vmem:[#allocation10 + $0x18] sm:$0xff] }
 0x12e   :  { %v212_v16 = vsub.f32 1.0, %v211_v20  ;;  %v239_v4 = vmul.f32 %v238_v58, %v189_v59  ;;  %v407_v14 = vld [vmem:[#allocation10 + $0xa0] sm:$0xff]  ;;  %v311_v27 = vld [vmem:[%s908_s4] sm:$0x3] }
 0x12f   :  { %v259_v28 = vadd.f32 %v848_v17, %v209_v25  ;;  %v243_v52 = vmul.f32 %v839_v6, %v242_v38  ;;  %456 = vmatpush.msra.mxu3 %v410_v62  ;;  %429 = vmatpush.msra.mxu2 %v392_v9  ;;  %v405_v25 = vld [vmem:[#allocation10 + $0x90] sm:$0xff]  ;;  %v403_v61 = vld [vmem:[#allocation10 + $0x80] sm:$0xff]  ;;  %v537_v42 = vld [vmem:[%s910_s6] ss:$0 sm:$0xff]  ;;  %s693_s6 = smov [#allocation12]  }
 0x130   :  { %v213_v32 = vmul.f32 %v555_v12, %v212_v16  ;;  %v388_v16 = vld [vmem:[#allocation10 + $0x8] sm:$0xff]  ;;  %s508_s25 = sshll.u32 %s693_s6, 4  ;;  %s509_s25 = int_to_ptr.vmem [resolvable:$true] %s508_s25 }
 0x131   :  { %333 = vmatmul.f32.vlgmr.msra.gmra.mxu0 %v259_v28  ;;  %362 = vmatmul.f32.vlgmr.msra.gmra.mxu1 %v259_v28  ;;  %v244_v55 = vadd.f32 %v839_v6, %v243_v52  ;;  %v313_v28 = vperm.slane %v311_v27, 0 }
 0x132   :  { %v214_v36 = vadd.f32 %v555_v12, %v213_v32  ;;  %457 = vmatpush.msra.mxu3 %v409_v8  ;;  %430 = vmatpush.msra.mxu2 %v391_v13 }
 0x133   :  { %v248_v15 = vsel %vm247_vm7, %v839_v6, %v244_v55  ;;  %v406_v6 = vld [vmem:[#allocation10 + $0x98] sm:$0xff] }
 0x134   :  { %v218_v45 = vsel %vm217_vm0, %v555_v12, %v214_v36  ;;  %v261_v12 = vadd.f32 %v848_v17, %v239_v4  ;;  %v253_v18 = vsel %vm250_vm8, %v252_v11, %v248_v15  ;;  %458 = vmatpush.msra.mxu3 %v408_v10  ;;  %431 = vmatpush.msra.mxu2 %v390_v19 }
 0x135   :  { %v223_v47 = vsel %vm220_vm1, %v222_v40, %v218_v45  ;;  %v254_v20 = vmul.f32 %v253_v18, %v190_v54 }
 0x136   :  { %v224_v50 = vmul.f32 %v223_v47, %v188_v39  ;;  %459 = vmatpush.msra.mxu3 %v407_v14  ;;  %432 = vmatpush.msra.mxu2 %v389_v22 }
 0x137   :  { %v262_v21 = vadd.f32 %v848_v17, %v254_v20 }
 0x138   :  { %v260_v53 = vadd.f32 %v848_v17, %v224_v50  ;;  %460 = vmatpush.msra.mxu3 %v406_v6  ;;  %433 = vmatpush.msra.mxu2 %v388_v16  ;;  %v314_v17 = vperm.slane %v311_v27, 1 }
 0x13a   :  { %336 = vmatmul.f32.gmra.mxu0 %v260_v53  ;;  %365 = vmatmul.f32.gmra.mxu1 %v260_v53 }
 0x13b   :  { %461 = vmatpush.msra.mxu3 %v405_v25  ;;  %434 = vmatpush.msra.mxu2 %v387_v23 }
 0x13d   :  { %462 = vmatpush.msra.mxu3 %v404_v26 }
 0x13f   :  { %463 = vmatpush.msra.mxu3 %v403_v61 }
 0x142   :  { %339 = vmatmul.f32.gmra.mxu0 %v261_v12  ;;  %368 = vmatmul.f32.gmra.mxu1 %v261_v12 }
 0x14a   :  { %342 = vmatmul.f32.gmra.mxu0 %v262_v21  ;;  %371 = vmatmul.f32.gmra.mxu1 %v262_v21 }
 0x1ae   :  { %v334_v29 = vpop.f32.mrf.mxu0  ;;  %v363_v30 = vpop.f32.mrf.mxu1 }
 0x1af   :  { %v335_v31 = vadd.f32 %v334_v29, %v313_v28  ;;  %v364_v32 = vadd.f32 %v363_v30, %v314_v17 }
 0x1b1   :  { %v375_v33 = vmax.f32 %v335_v31, 0.0  ;;  %v376_v34 = vmax.f32 %v364_v32, 0.0 }
 0x1b3   :  { %435 = vmatmul.f32.vlgmr.msra.gmra.mxu2 %v375_v33  ;;  %464 = vmatmul.f32.vlgmr.msra.gmra.mxu3 %v376_v34 }
 0x1b7   :  { %v337_v35 = vpop.f32.mrf.mxu0  ;;  %v366_v36 = vpop.f32.mrf.mxu1 }
 0x1b8   :  { %v338_v37 = vadd.f32 %v337_v35, %v313_v28  ;;  %v367_v38 = vadd.f32 %v366_v36, %v314_v17 }
 0x1ba   :  { %v377_v39 = vmax.f32 %v338_v37, 0.0  ;;  %v378_v40 = vmax.f32 %v367_v38, 0.0 }
 0x1bc   :  { %438 = vmatmul.f32.gmra.mxu2 %v377_v39  ;;  %467 = vmatmul.f32.gmra.mxu3 %v378_v40 }
 0x1bf   :  { %v340_v41 = vpop.f32.mrf.mxu0  ;;  %v369_v43 = vpop.f32.mrf.mxu1 }
 0x1c0   :  { %v341_v44 = vadd.f32 %v340_v41, %v313_v28  ;;  %v370_v45 = vadd.f32 %v369_v43, %v314_v17 }
 0x1c2   :  { %v379_v46 = vmax.f32 %v341_v44, 0.0  ;;  %v380_v47 = vmax.f32 %v370_v45, 0.0 }
 0x1c4   :  { %441 = vmatmul.f32.gmra.mxu2 %v379_v46  ;;  %470 = vmatmul.f32.gmra.mxu3 %v380_v47 }
 0x1c7   :  { %v343_v48 = vpop.f32.mrf.mxu0  ;;  %v372_v24 = vpop.f32.mrf.mxu1 }
 0x1c8   :  { %v344_v49 = vadd.f32 %v343_v48, %v313_v28  ;;  %v373_v50 = vadd.f32 %v372_v24, %v314_v17 }
 0x1ca   :  { %v381_v51 = vmax.f32 %v344_v49, 0.0  ;;  %v382_v52 = vmax.f32 %v373_v50, 0.0 }
 0x1cc   :  { %444 = vmatmul.f32.gmra.mxu2 %v381_v51  ;;  %473 = vmatmul.f32.gmra.mxu3 %v382_v52 }
 0x236   :  { %v436_v53 = vpop.f32.mrf.mxu2  ;;  %v465_v56 = vpop.f32.mrf.mxu3 }
 0x237   :  { %v466_v57 = vadd.f32 %v465_v56, %v436_v53 }
 0x239   :  { %v477_v58 = vadd.f32 %v537_v42, %v466_v57 }
 0x23b   :  { %v496_v59 = vadd.f32 %v477_v58, %v754_v1 }
 0x23d   :  { %500 = vst [vmem:[#allocation12] sm:$0xff] %v496_v59 }
 0x23f   :  { %v439_v55 = vpop.f32.mrf.mxu2  ;;  %v468_v60 = vpop.f32.mrf.mxu3 }
 0x240   :  { %v469_v62 = vadd.f32 %v468_v60, %v439_v55 }
 0x242   :  { %v478_v63 = vadd.f32 %v537_v42, %v469_v62 }
 0x244   :  { %v497_v4 = vadd.f32 %v478_v63, %v760_v3 }
 0x246   :  { %501 = vst [vmem:[#allocation12 + $0x8] sm:$0xff] %v497_v4 }
 0x247   :  { %v442_v5 = vpop.f32.mrf.mxu2  ;;  %v471_v7 = vpop.f32.mrf.mxu3 }
 0x248   :  { %v472_v8 = vadd.f32 %v471_v7, %v442_v5 }
 0x24a   :  { %v479_v15 = vadd.f32 %v537_v42, %v472_v8 }
 0x24c   :  { %v498_v9 = vadd.f32 %v479_v15, %v752_v0 }
 0x24e   :  { %502 = vst [vmem:[#allocation12 + $0x10] sm:$0xff] %v498_v9 }
 0x24f   :  { %v445_v10 = vpop.f32.mrf.mxu2  ;;  %v474_v11 = vpop.f32.mrf.mxu3 }
 0x250   :  { %v475_v12 = vadd.f32 %v474_v11, %v445_v10 }
 0x252   :  { %v480_v1 = vadd.f32 %v537_v42, %v475_v12 }
 0x254   :  { %v499_v3 = vadd.f32 %v480_v1, %v758_v2 }
 0x256   :  { %503 = vst [vmem:[#allocation12 + $0x18] sm:$0xff] %v499_v3 }
 0x257   :  { %516 = dma.vmem_to_hbm [thread:$0]  %s509_s25, 512, %s511_s28, [#allocation6], %s686_s11, %s686_s11, %s687_s12  }
 0x258   :  { %682 = dma.done.wait [#allocation6], 512  }
 0x259   :  { %683 = vsyncadd [#allocation6], 4294966784 }
 0x25a   :  { %521 = vsyncpa [#allocation5], 1 }
 0x25b   :  { %522 = vsyncpa [#allocation8], 1 }
 0x25c   :  { %523 = vsyncpa [#allocation11], 1 }
 0x25d   :  { %524 = vsyncpa [#allocation6], 1 }

</bundles_post_ra>
